<compile_context>
chip_gen: v6e
topology: v6e:2x2x1
jax: 0.10.0
libtpu: 0.0.40
codegen_flags: <defaults>
</compile_context>

<pallas_src>
import jax
import jax.numpy as jnp
from jax.experimental import pallas as pl
from jax.experimental.pallas import tpu as pltpu


def _dqn_kernel(x_ref, w1_ref, b1_ref, w2_ref, b2_ref, w3_ref, b3_ref, o_ref):
    # bf16 matmuls with f32 accumulation; f32 bias add; ReLU on the VPU.
    x = x_ref[...].astype(jnp.bfloat16)
    h1 = jnp.dot(x, w1_ref[...], preferred_element_type=jnp.float32) + b1_ref[...]
    h1 = jnp.maximum(h1, 0.0).astype(jnp.bfloat16)
    h2 = jnp.dot(h1, w2_ref[...], preferred_element_type=jnp.float32) + b2_ref[...]
    h2 = jnp.maximum(h2, 0.0).astype(jnp.bfloat16)
    out = jnp.dot(h2, w3_ref[...], preferred_element_type=jnp.float32) + b3_ref[...]
    o_ref[...] = out.astype(o_ref.dtype)


def _round_up(n, m):
    return ((n + m - 1) // m) * m


def _pad_to(x, rows, cols):
    r, c = x.shape
    return jnp.pad(x, ((0, rows - r), (0, cols - c)))


def prepare_dqn_params(params, compute_dtype=jnp.bfloat16):
    """One-time padding + dtype cast of the weights (hoisted out of the per-step forward).

    params: (w1, b1, w2, b2, w3, b3) with weights stored (in_features, out_features),
            i.e. PyTorch's W pre-transposed so the kernel computes y = x @ W + b.
    """
    w1, b1, w2, b2, w3, b3 = params
    d_in, h = w1.shape
    a = w3.shape[1]

    Dp = _round_up(max(d_in, 16), 16)      # bf16 sublane packing; no 128x K padding
    Hp = _round_up(h, 128)
    Ap = _round_up(max(a, 128), 128)       # lane-dense output / MXU-friendly N

    tensors = (
        _pad_to(w1.astype(jnp.float32), Dp, Hp).astype(compute_dtype),
        _pad_to(b1.reshape(1, -1).astype(jnp.float32), 1, Hp),
        _pad_to(w2.astype(jnp.float32), Hp, Hp).astype(compute_dtype),
        _pad_to(b2.reshape(1, -1).astype(jnp.float32), 1, Hp),
        _pad_to(w3.astype(jnp.float32), Hp, Ap).astype(compute_dtype),
        _pad_to(b3.reshape(1, -1).astype(jnp.float32), 1, Ap),
    )
    return {"dims": (d_in, Dp, Hp, a, Ap), "tensors": tensors}


def dqn_forward(x, prepared, *, batch_tile=256):
    """x: (B, *input_shape) float32. Returns (B, action_space) float32."""
    d_in, Dp, Hp, a, Ap = prepared["dims"]
    w1p, b1p, w2p, b2p, w3p, b3p = prepared["tensors"]

    B = x.shape[0]
    x2 = x.reshape(B, -1).astype(jnp.float32)          # x.view(x.size(0), -1)
    assert x2.shape[1] == d_in, "input feature dim does not match prepared params"

    # Batch tiling: small batches pad to a multiple of 8; large batches use 256-row tiles.
    TB = min(batch_tile, _round_up(max(B, 8), 8))
    Bp = _round_up(B, TB)
    xp = _pad_to(x2, Bp, Dp)

    grid = (Bp // TB,)

    flops = 2 * Bp * (Dp * Hp + Hp * Hp + Hp * Ap)
    bytes_accessed = int(
        xp.size * 4
        + sum(t.size * t.dtype.itemsize for t in prepared["tensors"])
        + Bp * Ap * 4
    )

    out_p = pl.pallas_call(
        _dqn_kernel,
        out_shape=jax.ShapeDtypeStruct((Bp, Ap), jnp.float32),
        grid=grid,
        in_specs=[
            pl.BlockSpec((TB, Dp), lambda i: (i, 0)),   # x tile, pipelined over batch
            pl.BlockSpec((Dp, Hp), lambda i: (0, 0)),   # weights/biases: VMEM-resident
            pl.BlockSpec((1, Hp), lambda i: (0, 0)),
            pl.BlockSpec((Hp, Hp), lambda i: (0, 0)),
            pl.BlockSpec((1, Hp), lambda i: (0, 0)),
            pl.BlockSpec((Hp, Ap), lambda i: (0, 0)),
            pl.BlockSpec((1, Ap), lambda i: (0, 0)),
        ],
        out_specs=pl.BlockSpec((TB, Ap), lambda i: (i, 0)),
        compiler_params=pltpu.CompilerParams(
            dimension_semantics=("parallel",),
            vmem_limit_bytes=48 * 1024 * 1024,
        ),
        cost_estimate=pl.CostEstimate(
            flops=flops, transcendentals=0, bytes_accessed=bytes_accessed
        ),
    )(xp, w1p, b1p, w2p, b2p, w3p, b3p)

    return out_p[:B, :a]


def init_dqn_params(key, in_features, action_space, hidden=256):
    """Deterministic init mirroring nn.Linear shapes (weights stored transposed)."""
    ks = jax.random.split(key, 6)

    def linear(kw, kb, fan_in, fan_out):
        bound = 1.0 / jnp.sqrt(jnp.float32(fan_in))
        w = jax.random.uniform(kw, (fan_in, fan_out), jnp.float32, -bound, bound)
        b = jax.random.uniform(kb, (fan_out,), jnp.float32, -bound, bound)
        return w, b

    w1, b1 = linear(ks[0], ks[1], in_features, hidden)
    w2, b2 = linear(ks[2], ks[3], hidden, hidden)
    w3, b3 = linear(ks[4], ks[5], hidden, action_space)
    return (w1, b1, w2, b2, w3, b3)


if __name__ == "__main__":
    # CartPole-style problem: input_shape=(4,), action_space=2, batch=2.
    key = jax.random.PRNGKey(0)
    k_x, k_p = jax.random.split(key)

    batch, in_features, action_space = 2, 4, 2
    x = jax.random.normal(k_x, (batch, in_features), jnp.float32)
    params = init_dqn_params(k_p, in_features, action_space)

    prepared = prepare_dqn_params(params)          # one-time weight padding + bf16 cast
    out = dqn_forward(x, prepared)
    jax.block_until_ready(out)
    assert out.shape == (batch, action_space)

    # Check 1: exact match against a plain-JAX bf16/f32-accum reference using the same
    # prepared (padded, bf16) weights — verifies the kernel math bit-for-bit-ish.
    d_in, Dp, Hp, a, Ap = prepared["dims"]
    w1p, b1p, w2p, b2p, w3p, b3p = prepared["tensors"]
    x2 = x.reshape(batch, -1).astype(jnp.float32)
    xb = jnp.pad(x2, ((0, 0), (0, Dp - d_in))).astype(jnp.bfloat16)
    r1 = jnp.maximum(jnp.dot(xb, w1p, preferred_element_type=jnp.float32) + b1p, 0.0)
    r1 = r1.astype(jnp.bfloat16)
    r2 = jnp.maximum(jnp.dot(r1, w2p, preferred_element_type=jnp.float32) + b2p, 0.0)
    r2 = r2.astype(jnp.bfloat16)
    ref_bf16 = (jnp.dot(r2, w3p, preferred_element_type=jnp.float32) + b3p)[:, :a]
    assert jnp.allclose(out, ref_bf16, atol=1e-4, rtol=1e-4)

    # Check 2: semantic check against the full-precision f32 PyTorch-equivalent forward
    # (looser tolerance because the kernel uses bf16 operands with f32 accumulation).
    w1, b1, w2, b2, w3, b3 = params
    h1 = jnp.maximum(x2 @ w1 + b1, 0.0)
    h2 = jnp.maximum(h1 @ w2 + b2, 0.0)
    ref_f32 = h2 @ w3 + b3
    assert jnp.allclose(out, ref_f32, atol=1e-1, rtol=1e-1)

    print("KERNEL_OK")
</pallas_src>

<mosaic_0001>
module attributes {stable_mosaic.version = 11 : i64} {
  func.func @_dqn_kernel(%arg0: i32, %arg1: memref<8x16xf32, #tpu.memory_space<vmem>>, %arg2: memref<16x256xbf16, #tpu.memory_space<vmem>>, %arg3: memref<1x256xf32, #tpu.memory_space<vmem>>, %arg4: memref<256x256xbf16, #tpu.memory_space<vmem>>, %arg5: memref<1x256xf32, #tpu.memory_space<vmem>>, %arg6: memref<256x128xbf16, #tpu.memory_space<vmem>>, %arg7: memref<1x128xf32, #tpu.memory_space<vmem>>, %arg8: memref<8x128xf32, #tpu.memory_space<vmem>>) attributes {dimension_semantics = [#tpu.dimension_semantics<parallel>], iteration_bounds = array<i64: 1>, scalar_prefetch = 0 : i64, scratch_operands = 0 : i64, tpu.core_type = #tpu.core_type<tc>, window_params = [{transform_indices = @transform_0, window_bounds = array<i64: 8, 16>}, {pipeline_mode = #tpu.pipeline_mode<synchronous>, transform_indices = @transform_1, window_bounds = array<i64: 16, 256>}, {pipeline_mode = #tpu.pipeline_mode<synchronous>, transform_indices = @transform_2, window_bounds = array<i64: 1, 256>}, {pipeline_mode = #tpu.pipeline_mode<synchronous>, transform_indices = @transform_3, window_bounds = array<i64: 256, 256>}, {pipeline_mode = #tpu.pipeline_mode<synchronous>, transform_indices = @transform_4, window_bounds = array<i64: 1, 256>}, {pipeline_mode = #tpu.pipeline_mode<synchronous>, transform_indices = @transform_5, window_bounds = array<i64: 256, 128>}, {pipeline_mode = #tpu.pipeline_mode<synchronous>, transform_indices = @transform_6, window_bounds = array<i64: 1, 128>}, {transform_indices = @transform_7, window_bounds = array<i64: 8, 128>}]} {
    %c0 = arith.constant 0 : index
    %c0_0 = arith.constant 0 : index
    %0 = vector.load %arg1[%c0, %c0_0] : memref<8x16xf32, #tpu.memory_space<vmem>>, vector<8x16xf32>
    %1 = arith.truncf %0 : vector<8x16xf32> to vector<8x16xbf16>
    %c0_1 = arith.constant 0 : index
    %c0_2 = arith.constant 0 : index
    %2 = vector.load %arg2[%c0_1, %c0_2] : memref<16x256xbf16, #tpu.memory_space<vmem>>, vector<16x256xbf16>
    %cst = arith.constant dense<0.000000e+00> : vector<8x256xf32>
    %3 = tpu.matmul %1, %2, %cst {dimension_numbers = #tpu.dot_dimension_numbers<[1], [0], [0], [1], [0, 0, 1, 1], [], []>} : vector<8x16xbf16>, vector<16x256xbf16>, vector<8x256xf32> -> vector<8x256xf32>
    %c0_3 = arith.constant 0 : index
    %c0_4 = arith.constant 0 : index
    %4 = vector.load %arg3[%c0_3, %c0_4] : memref<1x256xf32, #tpu.memory_space<vmem>>, vector<1x256xf32>
    %5 = vector.broadcast %4 : vector<1x256xf32> to vector<8x256xf32>
    %6 = arith.addf %3, %5 : vector<8x256xf32>
    %cst_5 = arith.constant 0.000000e+00 : f32
    %7 = vector.broadcast %cst_5 : f32 to vector<8x256xf32>
    %8 = arith.maximumf %6, %7 : vector<8x256xf32>
    %9 = arith.truncf %8 : vector<8x256xf32> to vector<8x256xbf16>
    %c0_6 = arith.constant 0 : index
    %c0_7 = arith.constant 0 : index
    %10 = vector.load %arg4[%c0_6, %c0_7] : memref<256x256xbf16, #tpu.memory_space<vmem>>, vector<256x256xbf16>
    %cst_8 = arith.constant dense<0.000000e+00> : vector<8x256xf32>
    %11 = tpu.matmul %9, %10, %cst_8 {dimension_numbers = #tpu.dot_dimension_numbers<[1], [0], [0], [1], [0, 0, 1, 1], [], []>} : vector<8x256xbf16>, vector<256x256xbf16>, vector<8x256xf32> -> vector<8x256xf32>
    %c0_9 = arith.constant 0 : index
    %c0_10 = arith.constant 0 : index
    %12 = vector.load %arg5[%c0_9, %c0_10] : memref<1x256xf32, #tpu.memory_space<vmem>>, vector<1x256xf32>
    %13 = vector.broadcast %12 : vector<1x256xf32> to vector<8x256xf32>
    %14 = arith.addf %11, %13 : vector<8x256xf32>
    %cst_11 = arith.constant 0.000000e+00 : f32
    %15 = vector.broadcast %cst_11 : f32 to vector<8x256xf32>
    %16 = arith.maximumf %14, %15 : vector<8x256xf32>
    %17 = arith.truncf %16 : vector<8x256xf32> to vector<8x256xbf16>
    %c0_12 = arith.constant 0 : index
    %c0_13 = arith.constant 0 : index
    %18 = vector.load %arg6[%c0_12, %c0_13] : memref<256x128xbf16, #tpu.memory_space<vmem>>, vector<256x128xbf16>
    %cst_14 = arith.constant dense<0.000000e+00> : vector<8x128xf32>
    %19 = tpu.matmul %17, %18, %cst_14 {dimension_numbers = #tpu.dot_dimension_numbers<[1], [0], [0], [1], [0, 0, 1, 1], [], []>} : vector<8x256xbf16>, vector<256x128xbf16>, vector<8x128xf32> -> vector<8x128xf32>
    %c0_15 = arith.constant 0 : index
    %c0_16 = arith.constant 0 : index
    %20 = vector.load %arg7[%c0_15, %c0_16] : memref<1x128xf32, #tpu.memory_space<vmem>>, vector<1x128xf32>
    %21 = vector.broadcast %20 : vector<1x128xf32> to vector<8x128xf32>
    %22 = arith.addf %19, %21 : vector<8x128xf32>
    %c0_17 = arith.constant 0 : index
    %c0_18 = arith.constant 0 : index
    %23 = vector.load %arg8[%c0_17, %c0_18] : memref<8x128xf32, #tpu.memory_space<vmem>>, vector<8x128xf32>
    tpu.vector_store %arg8[%c0_17, %c0_18], %22 {strides = array<i32>} : memref<8x128xf32, #tpu.memory_space<vmem>>, vector<8x128xf32>,
    return
  }
  func.func @transform_0(%arg0: i32) -> (i32, i32) {
    %c0_i32 = arith.constant 0 : i32
    %c0_i32_0 = arith.constant 0 : i32
    return %arg0, %c0_i32 : i32, i32
  }
  func.func @transform_1(%arg0: i32) -> (i32, i32) {
    %c0_i32 = arith.constant 0 : i32
    %c0_i32_0 = arith.constant 0 : i32
    %c0_i32_1 = arith.constant 0 : i32
    return %c0_i32, %c0_i32_0 : i32, i32
  }
  func.func @transform_2(%arg0: i32) -> (i32, i32) {
    %c0_i32 = arith.constant 0 : i32
    %c0_i32_0 = arith.constant 0 : i32
    %c0_i32_1 = arith.constant 0 : i32
    return %c0_i32, %c0_i32_0 : i32, i32
  }
  func.func @transform_3(%arg0: i32) -> (i32, i32) {
    %c0_i32 = arith.constant 0 : i32
    %c0_i32_0 = arith.constant 0 : i32
    %c0_i32_1 = arith.constant 0 : i32
    return %c0_i32, %c0_i32_0 : i32, i32
  }
  func.func @transform_4(%arg0: i32) -> (i32, i32) {
    %c0_i32 = arith.constant 0 : i32
    %c0_i32_0 = arith.constant 0 : i32
    %c0_i32_1 = arith.constant 0 : i32
    return %c0_i32, %c0_i32_0 : i32, i32
  }
  func.func @transform_5(%arg0: i32) -> (i32, i32) {
    %c0_i32 = arith.constant 0 : i32
    %c0_i32_0 = arith.constant 0 : i32
    %c0_i32_1 = arith.constant 0 : i32
    return %c0_i32, %c0_i32_0 : i32, i32
  }
  func.func @transform_6(%arg0: i32) -> (i32, i32) {
    %c0_i32 = arith.constant 0 : i32
    %c0_i32_0 = arith.constant 0 : i32
    %c0_i32_1 = arith.constant 0 : i32
    return %c0_i32, %c0_i32_0 : i32, i32
  }
  func.func @transform_7(%arg0: i32) -> (i32, i32) {
    %c0_i32 = arith.constant 0 : i32
    %c0_i32_0 = arith.constant 0 : i32
    return %arg0, %c0_i32 : i32, i32
  }
}

</mosaic_0001>

<bundles_post_ra>
// kernel: tpu_custom_call.1
= control target key start
LH: loop header
LB: loop body
LE: loop exit
PB: predicated region body
PF: predicated region fallthrough
CT: control target
= control target key end

     0   :  { %12 = vsyncpa [#allocation3], 0  ;;  %s931_s0 = inlined_call_operand.hbm [shape: f32[8,16], index: 0, kind: input, shape index: {}]   ;;  %s932_s1 = inlined_call_operand.hbm [shape: bf16[16,256], index: 1, kind: input, shape index: {}]   ;;  %s933_s2 = inlined_call_operand.vmem [shape: f32[1,256], index: 2, kind: input, shape index: {}]   ;;  %s934_s3 = inlined_call_operand.hbm [shape: bf16[256,256], index: 3, kind: input, shape index: {}]   ;;  %s935_s4 = inlined_call_operand.vmem [shape: f32[1,256], index: 4, kind: input, shape index: {}]   ;;  %s936_s5 = inlined_call_operand.hbm [shape: bf16[256,128], index: 5, kind: input, shape index: {}]   ;;  %s937_s6 = inlined_call_operand.vmem [shape: f32[1,128], index: 6, kind: input, shape index: {}]   ;;  %s938_s7 = inlined_call_operand.hbm [shape: f32[8,128], index: 7, kind: output, shape index: {}]  }
   0x1   :  { %13 = vsyncpa [#allocation6], 0 }
   0x2   :  { %14 = vsyncpa [#allocation9], 0 }
   0x3   :  { %15 = vsyncpa [#allocation4], 0  ;;  %s857_s24 = smov [#allocation5]  }
   0x4   :  { %s31_s25 = sshll.u32 %s857_s24, 4  ;;  %s32_s25 = int_to_ptr.vmem [resolvable:$true] %s31_s25 }
   0x5   :  { %s757_s26 = scalar_lea.vmem %s32_s25, 256  ;;  %p762_p1 = scmp.lt.s32.totalorder %s32_s25, %s32_s25 }
   0x6   :  { %p758_p0 = scmp.ne.s32.totalorder %s32_s25, %s757_s26  ;;  %p763_p2 = scmp.lt.s32.totalorder %s757_s26, %s757_s26 }
   0x8   :  { %p764_p3 = por %p763_p2, %p762_p1 }
   0xa   :  { %p765_p4 = pnand %p764_p3, %p758_p0 }
   0xc   :  { %768 = shalt.err (!%p765_p4)
}
   0xd   :  { %s858_s27 = smov 128   ;;  %s859_s28 = smov 8  }
   0xe   :  { %37 = dma.hbm_to_vmem [thread:$0]  %s932_s1, 256, %s32_s25, [#allocation6], %s858_s27, %s858_s27, %s859_s28  }
   0xf   :  { %s860_s8 = smov [#allocation2]   ;;  %s861_s10 = smov [#allocation7]  }
  0x10   :  { %s22_s9 = sshll.u32 %s860_s8, 4  ;;  %s45_s11 = sshll.u32 %s861_s10, 4  ;;  %s23_s9 = int_to_ptr.vmem [resolvable:$true] %s22_s9  ;;  %s46_s11 = int_to_ptr.vmem [resolvable:$true] %s45_s11 }
  0x11   :  { %s777_s12 = scalar_lea.vmem %s23_s9, 128  ;;  %p782_p6 = scmp.lt.s32.totalorder %s23_s9, %s23_s9 }
  0x12   :  { %p778_p5 = scmp.ne.s32.totalorder %s23_s9, %s777_s12  ;;  %p783_p7 = scmp.lt.s32.totalorder %s777_s12, %s777_s12 }
  0x14   :  { %p784_p8 = por %p783_p7, %p782_p6 }
  0x16   :  { %p785_p9 = pnand %p784_p8, %p778_p5 }
  0x18   :  { %788 = shalt.err (!%p785_p9)
}
  0x19   :  { %25 = dma.hbm_to_vmem [thread:$0]  %s931_s0, 128, %s23_s9, [#allocation3]  }
  0x1a   :  { %s797_s15 = scalar_lea.vmem %s46_s11, 4096  ;;  %p802_p11 = scmp.lt.s32.totalorder %s46_s11, %s46_s11 }
  0x1b   :  { %p798_p10 = scmp.ne.s32.totalorder %s46_s11, %s797_s15  ;;  %p803_p12 = scmp.lt.s32.totalorder %s797_s15, %s797_s15 }
  0x1d   :  { %p804_p13 = por %p803_p12, %p802_p11 }
  0x1f   :  { %p805_p0 = pnand %p804_p13, %p798_p10 }
  0x21   :  { %808 = shalt.err (!%p805_p0)
}
  0x22   :  { %51 = dma.hbm_to_vmem [thread:$0]  %s934_s3, 4096, %s46_s11, [#allocation6], %s858_s27, %s858_s27, %s859_s28  }
  0x23   :  { %s862_s17 = smov [#allocation8]  }
  0x24   :  { %s59_s18 = sshll.u32 %s862_s17, 4  ;;  %s60_s18 = int_to_ptr.vmem [resolvable:$true] %s59_s18 }
  0x25   :  { %s817_s19 = scalar_lea.vmem %s60_s18, 2048  ;;  %p822_p2 = scmp.lt.s32.totalorder %s60_s18, %s60_s18 }
  0x26   :  { %p818_p1 = scmp.ne.s32.totalorder %s60_s18, %s817_s19  ;;  %p823_p3 = scmp.lt.s32.totalorder %s817_s19, %s817_s19 }
  0x28   :  { %p824_p4 = por %p823_p3, %p822_p2 }
  0x2a   :  { %p825_p5 = pnand %p824_p4, %p818_p1 }
  0x2c   :  { %828 = shalt.err (!%p825_p5)
}
  0x2d   :  { %s863_s0 = smov 64   ;;  %s864_s20 = smov 4  }
  0x2e   :  { %65 = dma.hbm_to_vmem [thread:$0]  %s936_s5, 2048, %s60_s18, [#allocation9], %s863_s0, %s863_s0, %s864_s20  }
  0x2f   :  { %849 = dma.done.wait [#allocation3], 128  }
  0x30   :  { %850 = vsyncadd [#allocation3], 4294967168 }
  0x31   :  { %851 = dma.done.wait [#allocation6], 4352  }
  0x32   :  { %852 = vsyncadd [#allocation6], 4294962944 }
  0x33   :  { %853 = dma.done.wait [#allocation9], 2048  }
  0x34   :  { %854 = vsyncadd [#allocation9], 4294965248  ;;  %v865_v0 = vmov 0   ;;  %v682_v1 = vld [vmem:[#allocation5 + $0x4] ss:$8 sps:$4 sm:$0xff]   ;;  %v81_v3 = vld [vmem:[#allocation2] sm:$0xff]  ;;  %v87_v49 = vlaneseq }
  0x35   :  { %143 = vmatprep.mubr.bf16.mxu0 %v865_v0  ;;  %v684_v2 = vld [vmem:[#allocation5] ss:$8 sps:$4 sm:$0xff]   ;;  %125 = vmatprep.subr.bf16.mxu0 %v682_v1  ;;  %v82_v4 = vpack.c.bf16 %v81_v3, %v81_v3  ;;  %v685_v5 = vld [vmem:[#allocation7 + $0x74] ss:$8 sps:$4 sm:$0xff]   ;;  %vm107_vm0 = vcmask 130048   ;;  %v737_v41 = vld [vmem:[#allocation8 + $0x68] sm:$0xff]  }
  0x36   :  { %v687_v6 = vld [vmem:[#allocation7 + $0x70] ss:$8 sps:$4 sm:$0xff]   ;;  %126 = vmatpush1.bf16.msra.mxu0 %v684_v2  ;;  %v688_v7 = vld [vmem:[#allocation7 + $0x64] ss:$8 sps:$4 sm:$0xff]   ;;  %360 = vmatprep.subr.bf16.mxu1 %v685_v5  ;;  %v690_v8 = vld [vmem:[#allocation7 + $0x60] ss:$8 sps:$4 sm:$0xff]  }
  0x37   :  { %361 = vmatpush1.bf16.msra.mxu1 %v687_v6  ;;  %v691_v9 = vld [vmem:[#allocation7 + $0x54] ss:$8 sps:$4 sm:$0xff]   ;;  %v693_v10 = vld [vmem:[#allocation7 + $0x50] ss:$8 sps:$4 sm:$0xff]   ;;  %v694_v11 = vld [vmem:[#allocation7 + $0x44] ss:$8 sps:$4 sm:$0xff]  }
  0x38   :  { %362 = vmatprep.subr.bf16.mxu1 %v688_v7  ;;  %v696_v12 = vld [vmem:[#allocation7 + $0x40] ss:$8 sps:$4 sm:$0xff]   ;;  %v697_v13 = vld [vmem:[#allocation7 + $0x34] ss:$8 sps:$4 sm:$0xff]   ;;  %v699_v14 = vld [vmem:[#allocation7 + $0x30] ss:$8 sps:$4 sm:$0xff]  }
  0x39   :  { %600 = vmatmul.mubr.msk.bf16.vlgmr.msra.gmra.mxu0 %vm107_vm0, %v82_v4  ;;  %v700_v15 = vld [vmem:[#allocation7 + $0x24] ss:$8 sps:$4 sm:$0xff]   ;;  %v702_v16 = vld [vmem:[#allocation7 + $0x20] ss:$8 sps:$4 sm:$0xff]   ;;  %v703_v17 = vld [vmem:[#allocation7 + $0x14] ss:$8 sps:$4 sm:$0xff]  }
  0x3a   :  { %v705_v18 = vld [vmem:[#allocation7 + $0x10] ss:$8 sps:$4 sm:$0xff]   ;;  %v706_v19 = vld [vmem:[#allocation7 + $0x4] ss:$8 sps:$4 sm:$0xff]   ;;  %v708_v20 = vld [vmem:[#allocation7] ss:$8 sps:$4 sm:$0xff]  }
  0x3b   :  { %363 = vmatpush1.bf16.msra.mxu1 %v690_v8  ;;  %v709_v21 = vld [vmem:[#allocation7 + $0xf4] ss:$8 sps:$4 sm:$0xff]   ;;  %v711_v22 = vld [vmem:[#allocation7 + $0xf0] ss:$8 sps:$4 sm:$0xff]   ;;  %v712_v23 = vld [vmem:[#allocation7 + $0xe4] ss:$8 sps:$4 sm:$0xff]  }
  0x3c   :  { %364 = vmatprep.subr.bf16.mxu1 %v691_v9  ;;  %v714_v24 = vld [vmem:[#allocation7 + $0xe0] ss:$8 sps:$4 sm:$0xff]   ;;  %v715_v25 = vld [vmem:[#allocation7 + $0xd4] ss:$8 sps:$4 sm:$0xff]   ;;  %v717_v26 = vld [vmem:[#allocation7 + $0xd0] ss:$8 sps:$4 sm:$0xff]  }
  0x3d   :  { %v718_v27 = vld [vmem:[#allocation7 + $0xc4] ss:$8 sps:$4 sm:$0xff]   ;;  %v720_v28 = vld [vmem:[#allocation7 + $0xc0] ss:$8 sps:$4 sm:$0xff]   ;;  %v721_v29 = vld [vmem:[#allocation7 + $0xb4] ss:$8 sps:$4 sm:$0xff]  }
  0x3e   :  { %v723_v30 = vld [vmem:[#allocation7 + $0xb0] ss:$8 sps:$4 sm:$0xff]   ;;  %v724_v31 = vld [vmem:[#allocation7 + $0xa4] ss:$8 sps:$4 sm:$0xff]   ;;  %v726_v32 = vld [vmem:[#allocation7 + $0xa0] ss:$8 sps:$4 sm:$0xff]  }
  0x3f   :  { %365 = vmatpush1.bf16.msra.mxu1 %v693_v10  ;;  %v727_v33 = vld [vmem:[#allocation7 + $0x94] ss:$8 sps:$4 sm:$0xff]   ;;  %v729_v34 = vld [vmem:[#allocation7 + $0x90] ss:$8 sps:$4 sm:$0xff]   ;;  %v730_v35 = vld [vmem:[#allocation7 + $0x84] ss:$8 sps:$4 sm:$0xff]  }
  0x40   :  { %366 = vmatprep.subr.bf16.mxu1 %v694_v11  ;;  %v732_v36 = vld [vmem:[#allocation7 + $0x80] ss:$8 sps:$4 sm:$0xff]   ;;  %v733_v37 = vld [vmem:[#allocation8 + $0x78] sm:$0xff]   ;;  %v735_v39 = vld [vmem:[#allocation8 + $0x70] sm:$0xff]   ;;  %v88_v50 = vshrl.u32 %v87_v49, 7 }
  0x41   :  { %v734_v38 = vld [vmem:[#allocation8 + $0x38] sm:$0xff]   ;;  %650 = vmatprep.subr.bf16.mxu0 %v733_v37  ;;  %v736_v40 = vld [vmem:[#allocation8 + $0x30] sm:$0xff]   ;;  %v738_v42 = vld [vmem:[#allocation8 + $0x28] sm:$0xff]  }
  0x42   :  { %651 = vmatpush3.bf16.msra.mxu0 %v734_v38  ;;  %v739_v43 = vld [vmem:[#allocation8 + $0x60] sm:$0xff]   ;;  %v741_v45 = vld [vmem:[#allocation8 + $0x58] sm:$0xff]   ;;  %v743_v47 = vld [vmem:[#allocation8 + $0x50] sm:$0xff]   ;;  %v89_v51 = vsub.s32 0, %v88_v50  ;;  %v93_v53 = vsub.s32 1, %v88_v50 }
  0x43   :  { %367 = vmatpush1.bf16.msra.mxu1 %v696_v12  ;;  %652 = vmatprep.subr.bf16.mxu0 %v735_v39  ;;  %v740_v44 = vld [vmem:[#allocation8 + $0x20] sm:$0xff]   ;;  %v742_v46 = vld [vmem:[#allocation8 + $0x18] sm:$0xff]   ;;  %v744_v48 = vld [vmem:[#allocation8 + $0x10] sm:$0xff]  }
  0x44   :  { %368 = vmatprep.subr.bf16.mxu1 %v697_v13  ;;  %v85_v52 = vld [vmem:[%s933_s2] sm:$0x3]  ;;  %v747_v4 = vld [vmem:[#allocation8 + $0x40] sm:$0xff]  }
  0x45   :  { %v90_v54 = vrot.slane %v85_v52, %v89_v51  ;;  %v94_v55 = vrot.slane %v85_v52, %v93_v53  ;;  %v745_v2 = vld [vmem:[#allocation8 + $0x48] sm:$0xff]   ;;  %v748_v5 = vld [vmem:[#allocation8] sm:$0xff]  }
  0x46   :  { %653 = vmatpush3.bf16.msra.mxu0 %v736_v40  ;;  %v746_v3 = vld [vmem:[#allocation8 + $0x8] sm:$0xff]  }
  0x47   :  { %369 = vmatpush1.bf16.msra.mxu1 %v699_v14  ;;  %654 = vmatprep.subr.bf16.mxu0 %v737_v41  ;;  %v188_v6 = vld [vmem:[%s935_s4] sm:$0x3]  ;;  %s866_s4 = smov [#allocation10]  }
  0x48   :  { %370 = vmatprep.subr.bf16.mxu1 %v700_v15  ;;  %v193_v7 = vrot.slane %v188_v6, %v89_v51  ;;  %v197_v8 = vrot.slane %v188_v6, %v93_v53  ;;  %s587_s26 = sshll.u32 %s866_s4, 4  ;;  %s588_s26 = int_to_ptr.vmem [resolvable:$true] %s587_s26 }
  0x49   :  { %s829_s27 = scalar_lea.vmem %s588_s26, 128  ;;  %p834_p7 = scmp.lt.s32.totalorder %s588_s26, %s588_s26 }
  0x4a   :  { %655 = vmatpush3.bf16.msra.mxu0 %v738_v42  ;;  %p830_p6 = scmp.ne.s32.totalorder %s588_s26, %s829_s27  ;;  %p835_p8 = scmp.lt.s32.totalorder %s829_s27, %s829_s27 }
  0x4b   :  { %371 = vmatpush1.bf16.msra.mxu1 %v702_v16  ;;  %656 = vmatprep.subr.bf16.mxu0 %v739_v43 }
  0x4c   :  { %372 = vmatprep.subr.bf16.mxu1 %v703_v17  ;;  %p836_p9 = por %p835_p8, %p834_p7 }
  0x4e   :  { %657 = vmatpush3.bf16.msra.mxu0 %v740_v44  ;;  %p837_p10 = pnand %p836_p9, %p830_p6 }
  0x4f   :  { %373 = vmatpush1.bf16.msra.mxu1 %v705_v18  ;;  %658 = vmatprep.subr.bf16.mxu0 %v741_v45 }
  0x50   :  { %374 = vmatprep.subr.bf16.mxu1 %v706_v19 }
  0x52   :  { %659 = vmatpush3.bf16.msra.mxu0 %v742_v46 }
  0x53   :  { %375 = vmatpush1.bf16.msra.mxu1 %v708_v20  ;;  %660 = vmatprep.subr.bf16.mxu0 %v743_v47  ;;  %v633_v20 = vld [vmem:[%s937_s6] ss:$0 sm:$0xff] }
  0x54   :  { %376 = vmatprep.subr.bf16.mxu1 %v709_v21 }
  0x56   :  { %661 = vmatpush3.bf16.msra.mxu0 %v744_v48 }
  0x57   :  { %377 = vmatpush2.bf16.msra.mxu1 %v711_v22  ;;  %662 = vmatprep.subr.bf16.mxu0 %v745_v2 }
  0x58   :  { %378 = vmatprep.subr.bf16.mxu1 %v712_v23 }
  0x5a   :  { %663 = vmatpush3.bf16.msra.mxu0 %v746_v3 }
  0x5b   :  { %379 = vmatpush2.bf16.msra.mxu1 %v714_v24  ;;  %664 = vmatprep.subr.bf16.mxu0 %v747_v4 }
  0x5c   :  { %380 = vmatprep.subr.bf16.mxu1 %v715_v25 }
  0x5e   :  { %665 = vmatpush3.bf16.msra.mxu0 %v748_v5 }
  0x5f   :  { %381 = vmatpush2.bf16.msra.mxu1 %v717_v26 }
  0x60   :  { %382 = vmatprep.subr.bf16.mxu1 %v718_v27 }
  0x63   :  { %383 = vmatpush2.bf16.msra.mxu1 %v720_v28 }
  0x64   :  { %384 = vmatprep.subr.bf16.mxu1 %v721_v29 }
  0x67   :  { %385 = vmatpush2.bf16.msra.mxu1 %v723_v30 }
  0x68   :  { %386 = vmatprep.subr.bf16.mxu1 %v724_v31 }
  0x6b   :  { %387 = vmatpush2.bf16.msra.mxu1 %v726_v32 }
  0x6c   :  { %388 = vmatprep.subr.bf16.mxu1 %v727_v33 }
  0x6f   :  { %389 = vmatpush2.bf16.msra.mxu1 %v729_v34 }
  0x70   :  { %390 = vmatprep.subr.bf16.mxu1 %v730_v35 }
  0x73   :  { %391 = vmatpush2.bf16.msra.mxu1 %v732_v36 }
  0xf9   :  { %v145_v56 = vpop.f32.mrf.mxu0 }
  0xfa   :  { %v146_v57 = vadd.f32 %v145_v56, %v90_v54 }
  0xfb   :  { %v147_v58 = vpop.f32.mrf.mxu0 }
  0xfc   :  { %v148_v59 = vadd.f32 %v147_v58, %v94_v55  ;;  %v152_v60 = vmax.f32 %v146_v57, 0.0 }
  0xfd   :  { %v149_v61 = vpop.f32.mrf.mxu0 }
  0xfe   :  { %v153_v62 = vmax.f32 %v148_v59, 0.0  ;;  %v154_v1 = vpack.c.bf16 %v152_v60, %v152_v60 }
  0xff   :  { %v150_v63 = vpop.f32.mrf.mxu0 }
 0x100   :  { %v155_v0 = vpack.c.bf16 %v153_v62, %v153_v62 }
 0x102   :  { %392 = vmatprep.mubr.bf16.mxu1 %v155_v0 }
 0x103   :  { %393 = vmatmul.mubr.bf16.vlgmr.msra.gmra.mxu1 %v154_v1 }
 0x1c3   :  { %v394_v9 = vpop.f32.mrf.mxu1 }
 0x1c4   :  { %v395_v10 = vadd.f32 %v394_v9, %v193_v7 }
 0x1c5   :  { %v396_v11 = vpop.f32.mrf.mxu1 }
 0x1c6   :  { %v397_v12 = vadd.f32 %v396_v11, %v197_v8  ;;  %v401_v13 = vmax.f32 %v395_v10, 0.0 }
 0x1c7   :  { %v398_v14 = vpop.f32.mrf.mxu1 }
 0x1c8   :  { %v402_v15 = vmax.f32 %v397_v12, 0.0  ;;  %v403_v18 = vpack.c.bf16 %v401_v13, %v401_v13 }
 0x1c9   :  { %v399_v16 = vpop.f32.mrf.mxu1 }
 0x1ca   :  { %v404_v17 = vpack.c.bf16 %v402_v15, %v402_v15 }
 0x1cc   :  { %572 = vmatprep.mubr.bf16.mxu0 %v404_v17 }
 0x1cd   :  { %573 = vmatmul.mubr.bf16.vlgmr.msra.gmra.mxu0 %v403_v18 }
 0x28d   :  { %v666_v19 = vpop.f32.mrf.mxu0 }
 0x28f   :  { %v667_v21 = vpop.f32.mrf.mxu0 }
 0x290   :  { %v668_v22 = vadd.f32 %v667_v21, %v666_v19 }
 0x291   :  { %v669_v23 = vpop.f32.mrf.mxu0 }
 0x292   :  { %v575_v24 = vadd.f32 %v668_v22, %v633_v20 }
 0x293   :  { %v670_v25 = vpop.f32.mrf.mxu0 }
 0x294   :  { %580 = vst [vmem:[#allocation10] sm:$0xff] %v575_v24 }
 0x295   :  { %840 = shalt.err (!%p837_p10)
}
 0x296   :  { %590 = dma.vmem_to_hbm [thread:$0]  %s588_s26, 128, %s938_s7, [#allocation4]  }
 0x297   :  { %855 = dma.done.wait [#allocation4], 128  }
 0x298   :  { %856 = vsyncadd [#allocation4], 4294967168 }
 0x299   :  { %594 = vsyncpa [#allocation3], 1 }
 0x29a   :  { %595 = vsyncpa [#allocation6], 1 }
 0x29b   :  { %596 = vsyncpa [#allocation9], 1 }
 0x29c   :  { %597 = vsyncpa [#allocation4], 1 }

</bundles_post_ra>
